<compile_context>
chip_gen: v7x
topology: tpu7x:2x2x1
jax: 0.10.0
libtpu: 0.0.40
codegen_flags: <defaults>
</compile_context>

<pallas_src>
import math

import jax
import jax.numpy as jnp
from jax.experimental import pallas as pl
from jax.experimental.pallas import tpu as pltpu


def _round_up(x, m):
    return ((x + m - 1) // m) * m


# TODO(synk): the PyTorch module accepts an arbitrary activation_fn callable;
# here we support the common cases (relu / tanh / None) by name.
_ACTIVATIONS = {
    "relu": lambda h: jnp.maximum(h, 0.0),
    "tanh": jnp.tanh,
    None: lambda h: h,
}


def make_mlp_kernel(num_layers, activation, activation_on_output):
    act = _ACTIVATIONS[activation]

    def kernel(*refs):
        # refs = (x_tile, w0, b0, w1, b1, ..., out_tile)
        x_ref = refs[0]
        out_ref = refs[-1]
        param_refs = refs[1:-1]

        h = x_ref[...]                                   # (TILE_R, feats) bf16
        for i in range(num_layers):
            w = param_refs[2 * i][...]                   # bf16, lane-padded
            b = param_refs[2 * i + 1][...]               # (1, fan_out) f32
            acc = jnp.dot(h, w, preferred_element_type=jnp.float32) + b
            is_last = i == num_layers - 1
            if (not is_last) or activation_on_output:
                acc = act(acc)
            # Carry inter-layer activations in bf16 (halves vreg/VMEM pressure);
            # final layer stays f32 for the output store.
            h = acc if is_last else acc.astype(jnp.bfloat16)
        out_ref[...] = h.astype(out_ref.dtype)

    return kernel


def _choose_tile_r(rows, tile_rows):
    """Pick a row tile balancing padded work, per-step overhead and megacore."""
    candidates = [c for c in (512, 256, 128, 64, 32, 16) if c <= max(tile_rows, 16)]
    step_overhead_rows = 32          # ~0.35us/step expressed as "rows" of work
    best = None
    for c in candidates:
        rows_pad = _round_up(rows, c)
        steps = rows_pad // c
        cost = rows_pad + step_overhead_rows * steps
        if steps == 1 and rows > candidates[-1]:
            cost += rows_pad // 2    # one v7x TensorCore would sit idle
        key = (cost, -c)
        if best is None or key < best[0]:
            best = (key, c, rows_pad)
    return best[1], best[2]


def mlp_forward(x, params, *, activation="relu", activation_on_output=True,
                tile_rows=512):
    """x: (..., in_features). params: list of (W (in,out), b (out,)) f32."""
    *lead, feats = x.shape
    rows = int(math.prod(lead)) if lead else 1
    # bf16 input: first matmul already runs in bf16, so zero accuracy change,
    # but half the x HBM traffic / x-tile VMEM footprint.
    x2 = x.reshape(rows, feats).astype(jnp.bfloat16)

    num_layers = len(params)

    # Lane-dense padding: every hidden width (and the matching fan_in rows of
    # the following layer) is padded with zeros to a multiple of 128.
    dims = [feats] + [int(w.shape[1]) for w, _ in params]
    pad_dims = [feats] + [_round_up(d, 128) for d in dims[1:]]
    out_features = dims[-1]
    out_pad = pad_dims[-1]

    flat_params = []
    for i, (w, b) in enumerate(params):
        fan_in, fan_out = int(w.shape[0]), int(w.shape[1])
        fi_pad, fo_pad = pad_dims[i], pad_dims[i + 1]
        w = jnp.asarray(w, jnp.float32)
        b = jnp.asarray(b, jnp.float32).reshape(1, -1)
        w = jnp.pad(w, ((0, fi_pad - fan_in), (0, fo_pad - fan_out)))
        b = jnp.pad(b, ((0, 0), (0, fo_pad - fan_out)))
        flat_params.append(w.astype(jnp.bfloat16))   # bf16 weights, f32 accumulate
        flat_params.append(b)                        # f32 bias

    # Row tile / grid.
    tile_r, rows_pad = _choose_tile_r(rows, tile_rows)
    if rows_pad != rows:
        x2 = jnp.pad(x2, ((0, rows_pad - rows), (0, 0)))
    grid = (rows_pad // tile_r,)

    # Device VMEM capacity (fall back to the v7x per-TC 64 MiB if unknown).
    try:
        vmem_cap = int(getattr(pltpu.get_tpu_info(), "vmem_capacity_bytes",
                               64 * 1024 * 1024))
    except Exception:
        vmem_cap = 64 * 1024 * 1024

    param_bytes = sum(int(p.size) * p.dtype.itemsize for p in flat_params)
    max_w = max(pad_dims)
    flops = 2 * rows_pad * sum(pad_dims[i] * pad_dims[i + 1]
                               for i in range(num_layers))
    transcendentals = (rows_pad * sum(pad_dims[1:])
                       if activation == "tanh" else 0)
    bytes_accessed = (int(x2.size) * x2.dtype.itemsize
                      + param_bytes
                      + rows_pad * out_pad * 4)

    # TODO(synk): if bf16 weights ever outgrow VMEM (~24 MiB on v7x), add an
    # N-tiled / weight-streaming (pltpu.emit_pipeline) fallback instead of the
    # fully weight-resident scheme used here.

    def _call(single_buffer_params):
        in_specs = [pl.BlockSpec((tile_r, feats), lambda i: (i, 0))]
        for p in flat_params:
            kwargs = {}
            if single_buffer_params:
                # Constant index_map -> DMA'd once; a single buffer suffices.
                kwargs["pipeline_mode"] = pl.Buffered(1)
            in_specs.append(pl.BlockSpec(p.shape, lambda i: (0, 0), **kwargs))
        out_spec = pl.BlockSpec((tile_r, out_pad), lambda i: (i, 0))

        bufs = 1 if single_buffer_params else 2
        footprint = (2 * tile_r * feats * 2          # x tile, bf16, 2 buffers
                     + 2 * tile_r * out_pad * 4      # out tile, f32, 2 buffers
                     + bufs * param_bytes            # resident params
                     + tile_r * max_w * 6)           # live f32+bf16 h (rough)
        vmem_limit = int(min(0.9 * vmem_cap,
                             max(1.5 * footprint + (2 << 20), 16 << 20)))

        return pl.pallas_call(
            make_mlp_kernel(num_layers, activation, activation_on_output),
            out_shape=jax.ShapeDtypeStruct((rows_pad, out_pad), jnp.float32),
            grid=grid,
            in_specs=in_specs,
            out_specs=out_spec,
            compiler_params=pltpu.CompilerParams(
                dimension_semantics=("parallel",),      # 2 TCs on v7x
                vmem_limit_bytes=vmem_limit),
            cost_estimate=pl.CostEstimate(
                flops=flops, transcendentals=transcendentals,
                bytes_accessed=bytes_accessed),
        )(x2, *flat_params)

    try:
        q = _call(True)
    except Exception:
        # Fallback: this jax build rejected single-buffered resident params;
        # use default double-buffering (correctness identical).
        q = _call(False)

    q = q[:rows, :out_features]
    return q.reshape(*lead, out_features)


def mlp_forward_ref(x, params, *, activation="relu", activation_on_output=True):
    """Pure-JAX f32 reference matching MLP.forward."""
    act = _ACTIVATIONS[activation]
    h = x.astype(jnp.float32)
    n = len(params)
    for i, (w, b) in enumerate(params):
        h = jnp.matmul(h, w) + b.reshape(-1)
        if i < n - 1 or activation_on_output:
            h = act(h)
    return h


def init_mlp_params(key, in_features, mlp_units):
    """nn.Linear-style uniform(-1/sqrt(fan_in), 1/sqrt(fan_in)) init."""
    if isinstance(mlp_units, int):
        mlp_units = [mlp_units]
    params = []
    prev = in_features
    for units in mlp_units:
        key, kw, kb = jax.random.split(key, 3)
        bound = 1.0 / float(prev) ** 0.5
        w = jax.random.uniform(kw, (prev, units), jnp.float32, -bound, bound)
        b = jax.random.uniform(kb, (units,), jnp.float32, -bound, bound)
        params.append((w, b))
        prev = units
    return params


if __name__ == "__main__":
    key = jax.random.PRNGKey(0)

    # Small shapes consistent with MLP(in_features, mlp_units, relu).
    batch, agent, in_features = 2, 4, 32
    mlp_units = (64, 32)

    key, kx, kp = jax.random.split(key, 3)
    x = jax.random.normal(kx, (batch, agent, in_features), jnp.float32)
    params = init_mlp_params(kp, in_features, mlp_units)

    y = mlp_forward(x, params, activation="relu", activation_on_output=True)
    y = jax.block_until_ready(y)

    y_ref = mlp_forward_ref(x, params, activation="relu",
                            activation_on_output=True)
    assert y.shape == (batch, agent, mlp_units[-1])
    # bf16 matmul operands / bf16 carried activations (f32 accumulate)
    # -> loose tolerance vs f32 reference.
    max_err = float(jnp.max(jnp.abs(y - y_ref)))
    assert jnp.allclose(y, y_ref, atol=5e-2, rtol=5e-2), max_err

    print("KERNEL_OK")
</pallas_src>

<mosaic_0001>
module attributes {stable_mosaic.version = 11 : i64} {
  func.func @kernel(%arg0: i32, %arg1: memref<16x32xbf16, #tpu.memory_space<vmem>>, %arg2: memref<32x128xbf16, #tpu.memory_space<vmem>>, %arg3: memref<1x128xf32, #tpu.memory_space<vmem>>, %arg4: memref<128x128xbf16, #tpu.memory_space<vmem>>, %arg5: memref<1x128xf32, #tpu.memory_space<vmem>>, %arg6: memref<16x128xf32, #tpu.memory_space<vmem>>) attributes {dimension_semantics = [#tpu.dimension_semantics<parallel>], iteration_bounds = array<i64: 1>, scalar_prefetch = 0 : i64, scratch_operands = 0 : i64, tpu.core_type = #tpu.core_type<tc>, window_params = [{transform_indices = @transform_0, window_bounds = array<i64: 16, 32>}, {pipeline_mode = #tpu.pipeline_mode<synchronous>, transform_indices = @transform_1, window_bounds = array<i64: 32, 128>}, {pipeline_mode = #tpu.pipeline_mode<synchronous>, transform_indices = @transform_2, window_bounds = array<i64: 1, 128>}, {pipeline_mode = #tpu.pipeline_mode<synchronous>, transform_indices = @transform_3, window_bounds = array<i64: 128, 128>}, {pipeline_mode = #tpu.pipeline_mode<synchronous>, transform_indices = @transform_4, window_bounds = array<i64: 1, 128>}, {transform_indices = @transform_5, window_bounds = array<i64: 16, 128>}]} {
    %c0 = arith.constant 0 : index
    %c0_0 = arith.constant 0 : index
    %0 = vector.load %arg1[%c0, %c0_0] : memref<16x32xbf16, #tpu.memory_space<vmem>>, vector<16x32xbf16>
    %c0_1 = arith.constant 0 : index
    %c0_2 = arith.constant 0 : index
    %1 = vector.load %arg2[%c0_1, %c0_2] : memref<32x128xbf16, #tpu.memory_space<vmem>>, vector<32x128xbf16>
    %c0_3 = arith.constant 0 : index
    %c0_4 = arith.constant 0 : index
    %2 = vector.load %arg3[%c0_3, %c0_4] : memref<1x128xf32, #tpu.memory_space<vmem>>, vector<1x128xf32>
    %cst = arith.constant dense<0.000000e+00> : vector<16x128xf32>
    %3 = tpu.matmul %0, %1, %cst {dimension_numbers = #tpu.dot_dimension_numbers<[1], [0], [0], [1], [0, 0, 1, 1], [], []>} : vector<16x32xbf16>, vector<32x128xbf16>, vector<16x128xf32> -> vector<16x128xf32>
    %4 = vector.broadcast %2 : vector<1x128xf32> to vector<16x128xf32>
    %5 = arith.addf %3, %4 : vector<16x128xf32>
    %cst_5 = arith.constant 0.000000e+00 : f32
    %6 = vector.broadcast %cst_5 : f32 to vector<16x128xf32>
    %7 = arith.maximumf %5, %6 : vector<16x128xf32>
    %8 = arith.truncf %7 : vector<16x128xf32> to vector<16x128xbf16>
    %c0_6 = arith.constant 0 : index
    %c0_7 = arith.constant 0 : index
    %9 = vector.load %arg4[%c0_6, %c0_7] : memref<128x128xbf16, #tpu.memory_space<vmem>>, vector<128x128xbf16>
    %c0_8 = arith.constant 0 : index
    %c0_9 = arith.constant 0 : index
    %10 = vector.load %arg5[%c0_8, %c0_9] : memref<1x128xf32, #tpu.memory_space<vmem>>, vector<1x128xf32>
    %cst_10 = arith.constant dense<0.000000e+00> : vector<16x128xf32>
    %11 = tpu.matmul %8, %9, %cst_10 {dimension_numbers = #tpu.dot_dimension_numbers<[1], [0], [0], [1], [0, 0, 1, 1], [], []>} : vector<16x128xbf16>, vector<128x128xbf16>, vector<16x128xf32> -> vector<16x128xf32>
    %12 = vector.broadcast %10 : vector<1x128xf32> to vector<16x128xf32>
    %13 = arith.addf %11, %12 : vector<16x128xf32>
    %cst_11 = arith.constant 0.000000e+00 : f32
    %14 = vector.broadcast %cst_11 : f32 to vector<16x128xf32>
    %15 = arith.maximumf %13, %14 : vector<16x128xf32>
    %c0_12 = arith.constant 0 : index
    %c0_13 = arith.constant 0 : index
    %16 = vector.load %arg6[%c0_12, %c0_13] : memref<16x128xf32, #tpu.memory_space<vmem>>, vector<16x128xf32>
    tpu.vector_store %arg6[%c0_12, %c0_13], %15 {strides = array<i32>} : memref<16x128xf32, #tpu.memory_space<vmem>>, vector<16x128xf32>,
    return
  }
  func.func @transform_0(%arg0: i32) -> (i32, i32) {
    %c0_i32 = arith.constant 0 : i32
    %c0_i32_0 = arith.constant 0 : i32
    return %arg0, %c0_i32 : i32, i32
  }
  func.func @transform_1(%arg0: i32) -> (i32, i32) {
    %c0_i32 = arith.constant 0 : i32
    %c0_i32_0 = arith.constant 0 : i32
    %c0_i32_1 = arith.constant 0 : i32
    return %c0_i32, %c0_i32_0 : i32, i32
  }
  func.func @transform_2(%arg0: i32) -> (i32, i32) {
    %c0_i32 = arith.constant 0 : i32
    %c0_i32_0 = arith.constant 0 : i32
    %c0_i32_1 = arith.constant 0 : i32
    return %c0_i32, %c0_i32_0 : i32, i32
  }
  func.func @transform_3(%arg0: i32) -> (i32, i32) {
    %c0_i32 = arith.constant 0 : i32
    %c0_i32_0 = arith.constant 0 : i32
    %c0_i32_1 = arith.constant 0 : i32
    return %c0_i32, %c0_i32_0 : i32, i32
  }
  func.func @transform_4(%arg0: i32) -> (i32, i32) {
    %c0_i32 = arith.constant 0 : i32
    %c0_i32_0 = arith.constant 0 : i32
    %c0_i32_1 = arith.constant 0 : i32
    return %c0_i32, %c0_i32_0 : i32, i32
  }
  func.func @transform_5(%arg0: i32) -> (i32, i32) {
    %c0_i32 = arith.constant 0 : i32
    %c0_i32_0 = arith.constant 0 : i32
    return %arg0, %c0_i32 : i32, i32
  }
}

module attributes {stable_mosaic.version = 11 : i64} {
  func.func @kernel(%arg0: i32, %arg1: memref<16x32xbf16, #tpu.memory_space<vmem>>, %arg2: memref<32x128xbf16, #tpu.memory_space<vmem>>, %arg3: memref<1x128xf32, #tpu.memory_space<vmem>>, %arg4: memref<128x128xbf16, #tpu.memory_space<vmem>>, %arg5: memref<1x128xf32, #tpu.memory_space<vmem>>, %arg6: memref<16x128xf32, #tpu.memory_space<vmem>>) attributes {dimension_semantics = [#tpu.dimension_semantics<parallel>], iteration_bounds = array<i64: 1>, scalar_prefetch = 0 : i64, scratch_operands = 0 : i64, tpu.core_type = #tpu.core_type<tc>, window_params = [{transform_indices = @transform_0, window_bounds = array<i64: 16, 32>}, {pipeline_mode = #tpu.pipeline_mode<synchronous>, transform_indices = @transform_1, window_bounds = array<i64: 32, 128>}, {pipeline_mode = #tpu.pipeline_mode<synchronous>, transform_indices = @transform_2, window_bounds = array<i64: 1, 128>}, {pipeline_mode = #tpu.pipeline_mode<synchronous>, transform_indices = @transform_3, window_bounds = array<i64: 128, 128>}, {pipeline_mode = #tpu.pipeline_mode<synchronous>, transform_indices = @transform_4, window_bounds = array<i64: 1, 128>}, {transform_indices = @transform_5, window_bounds = array<i64: 16, 128>}]} {
    %c0 = arith.constant 0 : index
    %c0_0 = arith.constant 0 : index
    %0 = vector.load %arg1[%c0, %c0_0] : memref<16x32xbf16, #tpu.memory_space<vmem>>, vector<16x32xbf16>
    %c0_1 = arith.constant 0 : index
    %c0_2 = arith.constant 0 : index
    %1 = vector.load %arg2[%c0_1, %c0_2] : memref<32x128xbf16, #tpu.memory_space<vmem>>, vector<32x128xbf16>
    %c0_3 = arith.constant 0 : index
    %c0_4 = arith.constant 0 : index
    %2 = vector.load %arg3[%c0_3, %c0_4] : memref<1x128xf32, #tpu.memory_space<vmem>>, vector<1x128xf32>
    %cst = arith.constant dense<0.000000e+00> : vector<16x128xf32>
    %3 = tpu.matmul %0, %1, %cst {dimension_numbers = #tpu.dot_dimension_numbers<[1], [0], [0], [1], [0, 0, 1, 1], [], []>} : vector<16x32xbf16>, vector<32x128xbf16>, vector<16x128xf32> -> vector<16x128xf32>
    %4 = vector.broadcast %2 : vector<1x128xf32> to vector<16x128xf32>
    %5 = arith.addf %3, %4 : vector<16x128xf32>
    %cst_5 = arith.constant 0.000000e+00 : f32
    %6 = vector.broadcast %cst_5 : f32 to vector<16x128xf32>
    %7 = arith.maximumf %5, %6 : vector<16x128xf32>
    %8 = arith.truncf %7 : vector<16x128xf32> to vector<16x128xbf16>
    %c0_6 = arith.constant 0 : index
    %c0_7 = arith.constant 0 : index
    %9 = vector.load %arg4[%c0_6, %c0_7] : memref<128x128xbf16, #tpu.memory_space<vmem>>, vector<128x128xbf16>
    %c0_8 = arith.constant 0 : index
    %c0_9 = arith.constant 0 : index
    %10 = vector.load %arg5[%c0_8, %c0_9] : memref<1x128xf32, #tpu.memory_space<vmem>>, vector<1x128xf32>
    %cst_10 = arith.constant dense<0.000000e+00> : vector<16x128xf32>
    %11 = tpu.matmul %8, %9, %cst_10 {dimension_numbers = #tpu.dot_dimension_numbers<[1], [0], [0], [1], [0, 0, 1, 1], [], []>} : vector<16x128xbf16>, vector<128x128xbf16>, vector<16x128xf32> -> vector<16x128xf32>
    %12 = vector.broadcast %10 : vector<1x128xf32> to vector<16x128xf32>
    %13 = arith.addf %11, %12 : vector<16x128xf32>
    %cst_11 = arith.constant 0.000000e+00 : f32
    %14 = vector.broadcast %cst_11 : f32 to vector<16x128xf32>
    %15 = arith.maximumf %13, %14 : vector<16x128xf32>
    %c0_12 = arith.constant 0 : index
    %c0_13 = arith.constant 0 : index
    %16 = vector.load %arg6[%c0_12, %c0_13] : memref<16x128xf32, #tpu.memory_space<vmem>>, vector<16x128xf32>
    tpu.vector_store %arg6[%c0_12, %c0_13], %15 {strides = array<i32>} : memref<16x128xf32, #tpu.memory_space<vmem>>, vector<16x128xf32>,
    return
  }
  func.func @transform_0(%arg0: i32) -> (i32, i32) {
    %c0_i32 = arith.constant 0 : i32
    %c0_i32_0 = arith.constant 0 : i32
    return %arg0, %c0_i32 : i32, i32
  }
  func.func @transform_1(%arg0: i32) -> (i32, i32) {
    %c0_i32 = arith.constant 0 : i32
    %c0_i32_0 = arith.constant 0 : i32
    %c0_i32_1 = arith.constant 0 : i32
    return %c0_i32, %c0_i32_0 : i32, i32
  }
  func.func @transform_2(%arg0: i32) -> (i32, i32) {
    %c0_i32 = arith.constant 0 : i32
    %c0_i32_0 = arith.constant 0 : i32
    %c0_i32_1 = arith.constant 0 : i32
    return %c0_i32, %c0_i32_0 : i32, i32
  }
  func.func @transform_3(%arg0: i32) -> (i32, i32) {
    %c0_i32 = arith.constant 0 : i32
    %c0_i32_0 = arith.constant 0 : i32
    %c0_i32_1 = arith.constant 0 : i32
    return %c0_i32, %c0_i32_0 : i32, i32
  }
  func.func @transform_4(%arg0: i32) -> (i32, i32) {
    %c0_i32 = arith.constant 0 : i32
    %c0_i32_0 = arith.constant 0 : i32
    %c0_i32_1 = arith.constant 0 : i32
    return %c0_i32, %c0_i32_0 : i32, i32
  }
  func.func @transform_5(%arg0: i32) -> (i32, i32) {
    %c0_i32 = arith.constant 0 : i32
    %c0_i32_0 = arith.constant 0 : i32
    return %arg0, %c0_i32 : i32, i32
  }
}

</mosaic_0001>

<bundles_post_ra>
// kernel: tpu_custom_call.1
= control target key start
LH: loop header
LB: loop body
LE: loop exit
PB: predicated region body
PF: predicated region fallthrough
CT: control target
= control target key end

     0   :  { %10 = vsyncpa [#allocation3], 0  ;;  %s554_s0 = inlined_call_operand.hbm [shape: bf16[16,32], index: 0, kind: input, shape index: {}]   ;;  %s555_s1 = inlined_call_operand.hbm [shape: bf16[32,128], index: 1, kind: input, shape index: {}]   ;;  %s556_s2 = inlined_call_operand.vmem [shape: f32[1,128], index: 2, kind: input, shape index: {}]   ;;  %s557_s3 = inlined_call_operand.hbm [shape: bf16[128,128], index: 3, kind: input, shape index: {}]   ;;  %s558_s4 = inlined_call_operand.vmem [shape: f32[1,128], index: 4, kind: input, shape index: {}]   ;;  %s559_s5 = inlined_call_operand.hbm [shape: f32[16,128], index: 5, kind: output, shape index: {}]  }
   0x1   :  { %11 = vsyncpa [#allocation6], 0 }
   0x2   :  { %12 = vsyncpa [#allocation4], 0  ;;  %s444_s18 = smov [#allocation5]   ;;  %s445_s20 = smov [#allocation2]  }
   0x3   :  { %s30_s19 = sshll.u32 %s444_s18, 4  ;;  %s18_s21 = sshll.u32 %s445_s20, 4  ;;  %s31_s19 = int_to_ptr.vmem [resolvable:$true] %s30_s19  ;;  %s484_s21 = int_to_ptr.vmem [resolvable:$true] %s18_s21 }
   0x4   :  { %s350_s24 = scalar_lea.hbm %s555_s1, 256 }
   0x5   :  { %p351_p0 = scmp.ne.s32.totalorder %s555_s1, %s350_s24  ;;  %p354_p1 = scmp.lt.u32.totalorder %s350_s24, %s555_s1 }
   0x7   :  { %p356_p2 = pnand %p354_p1, %p351_p0 }
   0x9   :  { %359 = shalt.err (!%p356_p2)
}
   0xa   :  { %s360_s29 = scalar_lea.vmem %s31_s19, 256  ;;  %p365_p4 = scmp.lt.s32.totalorder %s31_s19, %s31_s19 }
   0xb   :  { %p361_p3 = scmp.ne.s32.totalorder %s31_s19, %s360_s29  ;;  %p366_p5 = scmp.lt.s32.totalorder %s360_s29, %s360_s29 }
   0xd   :  { %p367_p6 = por %p366_p5, %p365_p4 }
   0xf   :  { %p368_p7 = pnand %p367_p6, %p361_p3 }
  0x11   :  { %371 = shalt.err (!%p368_p7)
}
  0x12   :  { %s446_s30 = smov 64   ;;  %s447_s6 = smov 4  }
  0x13   :  { %36 = dma.hbm_to_vmem [thread:$0]  %s555_s1, 256, %s31_s19, [#allocation6], %s446_s30, %s446_s30, %s447_s6  }
  0x14   :  { %s372_s11 = scalar_lea.hbm %s554_s0, 128 }
  0x15   :  { %p373_p8 = scmp.ne.s32.totalorder %s554_s0, %s372_s11  ;;  %p376_p9 = scmp.lt.u32.totalorder %s372_s11, %s554_s0 }
  0x17   :  { %p378_p10 = pnand %p376_p9, %p373_p8 }
  0x19   :  { %381 = shalt.err (!%p378_p10)
}
  0x1a   :  { %s382_s16 = scalar_lea.vmem %s484_s21, 128  ;;  %p387_p12 = scmp.lt.s32.totalorder %s484_s21, %s484_s21 }
  0x1b   :  { %p383_p11 = scmp.ne.s32.totalorder %s484_s21, %s382_s16  ;;  %p388_p13 = scmp.lt.s32.totalorder %s382_s16, %s382_s16 }
  0x1d   :  { %p389_p0 = por %p388_p13, %p387_p12 }
  0x1f   :  { %p390_p1 = pnand %p389_p0, %p383_p11 }
  0x21   :  { %393 = shalt.err (!%p390_p1)
}
  0x22   :  { %24 = dma.hbm_to_vmem [thread:$0]  %s554_s0, 128, %s484_s21, [#allocation3], %s446_s30, %s446_s30, %s447_s6  }
  0x23   :  { %s448_s18 = smov [#allocation7]   ;;  %s394_s23 = scalar_lea.hbm %s557_s3, 1024 }
  0x24   :  { %s44_s19 = sshll.u32 %s448_s18, 4  ;;  %p395_p2 = scmp.ne.s32.totalorder %s557_s3, %s394_s23  ;;  %s45_s19 = int_to_ptr.vmem [resolvable:$true] %s44_s19 }
  0x25   :  { %p398_p3 = scmp.lt.u32.totalorder %s394_s23, %s557_s3 }
  0x27   :  { %p400_p4 = pnand %p398_p3, %p395_p2 }
  0x29   :  { %403 = shalt.err (!%p400_p4)
}
  0x2a   :  { %s404_s28 = scalar_lea.vmem %s45_s19, 1024  ;;  %p409_p6 = scmp.lt.s32.totalorder %s45_s19, %s45_s19 }
  0x2b   :  { %p405_p5 = scmp.ne.s32.totalorder %s45_s19, %s404_s28  ;;  %p410_p7 = scmp.lt.s32.totalorder %s404_s28, %s404_s28 }
  0x2d   :  { %p411_p8 = por %p410_p7, %p409_p6 }
  0x2f   :  { %p412_p9 = pnand %p411_p8, %p405_p5 }
  0x31   :  { %415 = shalt.err (!%p412_p9)
}
  0x32   :  { %50 = dma.hbm_to_vmem [thread:$0]  %s557_s3, 1024, %s45_s19, [#allocation6], %s446_s30, %s446_s30, %s447_s6  }
  0x33   :  { %438 = dma.done.wait [#allocation3], 128  }
  0x34   :  { %439 = vsyncadd [#allocation3], 4294967168 }
  0x35   :  { %440 = dma.done.wait [#allocation6], 1280  }
  0x36   :  { %441 = vsyncadd [#allocation6], 4294966016  ;;  %v449_v0 = vmov 0.0   ;;  %vm450_vm0 = vmmov 0   ;;  %v339_v1 = vld [vmem:[#allocation5] sm:$0xff]   ;;  %v340_v2 = vld [vmem:[#allocation5 + $0x8] sm:$0xff]  }
  0x37   :  { %301 = vmatprep.subr.bf16.mxu0 %v449_v0  ;;  %305 = vmatprep.mubr.msk.bf16.mxu0 %vm450_vm0, %v449_v0  ;;  %v342_v3 = vld [vmem:[#allocation7] sm:$0xff]   ;;  %v341_v4 = vld [vmem:[#allocation2] sm:$0xff]   ;;  %vm93_vm1 = vcmask 261120   ;;  %v344_v6 = vld [vmem:[#allocation7 + $0x10] sm:$0xff]   ;;  %s451_s7 = smov [#allocation8]  }
  0x38   :  { %309 = vmatprep.subr.bf16.mxu1 %v449_v0  ;;  %325 = vmatprep.mubr.msk.bf16.mxu1 %vm450_vm0, %v449_v0  ;;  %v343_v5 = vld [vmem:[#allocation7 + $0x8] sm:$0xff]   ;;  %v345_v7 = vld [vmem:[#allocation7 + $0x18] sm:$0xff]   ;;  %v346_v8 = vld [vmem:[#allocation7 + $0x20] sm:$0xff]   ;;  %s262_s8 = sshll.u32 %s451_s7, 4  ;;  %s263_s8 = int_to_ptr.vmem [resolvable:$true] %s262_s8 }
  0x39   :  { %302 = vmatpush3.bf16.msra.mxu0 %v339_v1  ;;  %310 = vmatpush3.bf16.msra.mxu1 %v342_v3  ;;  %v347_v9 = vld [vmem:[#allocation7 + $0x28] sm:$0xff]   ;;  %v348_v10 = vld [vmem:[#allocation7 + $0x30] sm:$0xff]   ;;  %v349_v11 = vld [vmem:[#allocation7 + $0x38] sm:$0xff]   ;;  %p421_p11 = scmp.lt.s32.totalorder %s263_s8, %s263_s8 }
  0x3a   :  { %303 = vmatprep.subr.bf16.mxu0 %v449_v0  ;;  %311 = vmatprep.subr.bf16.mxu1 %v449_v0  ;;  %v275_v12 = vld [vmem:[%s556_s2] ss:$0 sm:$0xff]  ;;  %s416_s2 = scalar_lea.vmem %s263_s8, 256 }
  0x3b   :  { %v280_v22 = vld [vmem:[%s558_s4] ss:$0 sm:$0xff]  ;;  %p417_p10 = scmp.ne.s32.totalorder %s263_s8, %s416_s2  ;;  %p422_p12 = scmp.lt.s32.totalorder %s416_s2, %s416_s2 }
  0x3d   :  { %304 = vmatpush3.bf16.msra.mxu0 %v340_v2  ;;  %312 = vmatpush3.bf16.msra.mxu1 %v343_v5  ;;  %p423_p13 = por %p422_p12, %p421_p11 }
  0x3e   :  { %313 = vmatprep.subr.bf16.mxu1 %v449_v0 }
  0x3f   :  { %p424_p0 = pnand %p423_p13, %p417_p10 }
  0x40   :  { %306 = vmatmul.mubr.msk.bf16.vlgmr.msra.gmra.mrb[0].mxu0 %vm93_vm1, %v341_v4 }
  0x41   :  { %314 = vmatpush3.bf16.msra.mxu1 %v344_v6 }
  0x42   :  { %315 = vmatprep.subr.bf16.mxu1 %v449_v0 }
  0x45   :  { %316 = vmatpush3.bf16.msra.mxu1 %v345_v7 }
  0x46   :  { %317 = vmatprep.subr.bf16.mxu1 %v449_v0 }
  0x49   :  { %318 = vmatpush3.bf16.msra.mxu1 %v346_v8 }
  0x4a   :  { %319 = vmatprep.subr.bf16.mxu1 %v449_v0 }
  0x4d   :  { %320 = vmatpush3.bf16.msra.mxu1 %v347_v9 }
  0x4e   :  { %321 = vmatprep.subr.bf16.mxu1 %v449_v0 }
  0x51   :  { %322 = vmatpush3.bf16.msra.mxu1 %v348_v10 }
  0x52   :  { %323 = vmatprep.subr.bf16.mxu1 %v449_v0 }
  0x55   :  { %324 = vmatpush3.bf16.msra.mxu1 %v349_v11 }
 0x113   :  { %v131_v13 = vpop.f32.mrb[0].mxu0 }
 0x114   :  { %v132_v14 = vadd.f32 %v275_v12, %v131_v13  ;;  %v307_v15 = vpop.f32.mrb[1].mxu0 }
 0x115   :  { %v134_v16 = vpop.f32.mrb[2].mxu0 }
 0x116   :  { %v135_v17 = vadd.f32 %v275_v12, %v134_v16  ;;  %v308_v18 = vpop.f32.mrb[3].mxu0  ;;  %v138_v19 = vmax.f32 %v132_v14, 0.0 }
 0x118   :  { %v139_v20 = vmax.f32 %v135_v17, 0.0 }
 0x11a   :  { %v140_v21 = vpack.c.bf16 %v139_v20, %v138_v19 }
 0x11c   :  { %326 = vmatmul.mubr.bf16.vlgmr.msra.gmra.mrb[0].mxu1 %v140_v21 }
 0x1ef   :  { %v246_v23 = vpop.f32.mrb[0].mxu1 }
 0x1f0   :  { %v247_v24 = vadd.f32 %v280_v22, %v246_v23  ;;  %v327_v25 = vpop.f32.mrb[1].mxu1 }
 0x1f1   :  { %v249_v26 = vpop.f32.mrb[2].mxu1 }
 0x1f2   :  { %v253_v27 = vmax.f32 %v247_v24, 0.0  ;;  %v250_v28 = vadd.f32 %v280_v22, %v249_v26  ;;  %v328_v29 = vpop.f32.mrb[3].mxu1 }
 0x1f4   :  { %255 = vst [vmem:[#allocation8] sm:$0xff] %v253_v27  ;;  %v254_v30 = vmax.f32 %v250_v28, 0.0 }
 0x1f6   :  { %256 = vst [vmem:[#allocation8 + $0x8] sm:$0xff] %v254_v30 }
 0x1f7   :  { %427 = shalt.err (!%p424_p0)
}
 0x1f8   :  { %s428_s10 = scalar_lea.hbm %s559_s5, 256 }
 0x1f9   :  { %p429_p1 = scmp.ne.s32.totalorder %s559_s5, %s428_s10  ;;  %p432_p2 = scmp.lt.u32.totalorder %s428_s10, %s559_s5 }
 0x1fb   :  { %p434_p3 = pnand %p432_p2, %p429_p1 }
 0x1fd   :  { %437 = shalt.err (!%p434_p3)
}
 0x1fe   :  { %s452_s15 = smov 128   ;;  %s453_s16 = smov 8  }
 0x1ff   :  { %268 = dma.vmem_to_hbm [thread:$0]  %s263_s8, 256, %s559_s5, [#allocation4], %s452_s15, %s452_s15, %s453_s16  }
 0x200   :  { %442 = dma.done.wait [#allocation4], 256  }
 0x201   :  { %443 = vsyncadd [#allocation4], 4294967040 }
 0x202   :  { %272 = vsyncpa [#allocation3], 1 }
 0x203   :  { %273 = vsyncpa [#allocation6], 1 }
 0x204   :  { %274 = vsyncpa [#allocation4], 1 }

// kernel: tpu_custom_call.1
= control target key start
LH: loop header
LB: loop body
LE: loop exit
PB: predicated region body
PF: predicated region fallthrough
CT: control target
= control target key end

     0   :  { %10 = vsyncpa [#allocation3], 0  ;;  %s554_s0 = inlined_call_operand.hbm [shape: bf16[16,32], index: 0, kind: input, shape index: {}]   ;;  %s555_s1 = inlined_call_operand.hbm [shape: bf16[32,128], index: 1, kind: input, shape index: {}]   ;;  %s556_s2 = inlined_call_operand.vmem [shape: f32[1,128], index: 2, kind: input, shape index: {}]   ;;  %s557_s3 = inlined_call_operand.hbm [shape: bf16[128,128], index: 3, kind: input, shape index: {}]   ;;  %s558_s4 = inlined_call_operand.vmem [shape: f32[1,128], index: 4, kind: input, shape index: {}]   ;;  %s559_s5 = inlined_call_operand.hbm [shape: f32[16,128], index: 5, kind: output, shape index: {}]  }
   0x1   :  { %11 = vsyncpa [#allocation6], 0 }
   0x2   :  { %12 = vsyncpa [#allocation4], 0  ;;  %s444_s18 = smov [#allocation5]   ;;  %s445_s20 = smov [#allocation2]  }
   0x3   :  { %s30_s19 = sshll.u32 %s444_s18, 4  ;;  %s18_s21 = sshll.u32 %s445_s20, 4  ;;  %s31_s19 = int_to_ptr.vmem [resolvable:$true] %s30_s19  ;;  %s484_s21 = int_to_ptr.vmem [resolvable:$true] %s18_s21 }
   0x4   :  { %s350_s24 = scalar_lea.hbm %s555_s1, 256 }
   0x5   :  { %p351_p0 = scmp.ne.s32.totalorder %s555_s1, %s350_s24  ;;  %p354_p1 = scmp.lt.u32.totalorder %s350_s24, %s555_s1 }
   0x7   :  { %p356_p2 = pnand %p354_p1, %p351_p0 }
   0x9   :  { %359 = shalt.err (!%p356_p2)
}
   0xa   :  { %s360_s29 = scalar_lea.vmem %s31_s19, 256  ;;  %p365_p4 = scmp.lt.s32.totalorder %s31_s19, %s31_s19 }
   0xb   :  { %p361_p3 = scmp.ne.s32.totalorder %s31_s19, %s360_s29  ;;  %p366_p5 = scmp.lt.s32.totalorder %s360_s29, %s360_s29 }
   0xd   :  { %p367_p6 = por %p366_p5, %p365_p4 }
   0xf   :  { %p368_p7 = pnand %p367_p6, %p361_p3 }
  0x11   :  { %371 = shalt.err (!%p368_p7)
}
  0x12   :  { %s446_s30 = smov 64   ;;  %s447_s6 = smov 4  }
  0x13   :  { %36 = dma.hbm_to_vmem [thread:$0]  %s555_s1, 256, %s31_s19, [#allocation6], %s446_s30, %s446_s30, %s447_s6  }
  0x14   :  { %s372_s11 = scalar_lea.hbm %s554_s0, 128 }
  0x15   :  { %p373_p8 = scmp.ne.s32.totalorder %s554_s0, %s372_s11  ;;  %p376_p9 = scmp.lt.u32.totalorder %s372_s11, %s554_s0 }
  0x17   :  { %p378_p10 = pnand %p376_p9, %p373_p8 }
  0x19   :  { %381 = shalt.err (!%p378_p10)
}
  0x1a   :  { %s382_s16 = scalar_lea.vmem %s484_s21, 128  ;;  %p387_p12 = scmp.lt.s32.totalorder %s484_s21, %s484_s21 }
  0x1b   :  { %p383_p11 = scmp.ne.s32.totalorder %s484_s21, %s382_s16  ;;  %p388_p13 = scmp.lt.s32.totalorder %s382_s16, %s382_s16 }
  0x1d   :  { %p389_p0 = por %p388_p13, %p387_p12 }
  0x1f   :  { %p390_p1 = pnand %p389_p0, %p383_p11 }
  0x21   :  { %393 = shalt.err (!%p390_p1)
}
  0x22   :  { %24 = dma.hbm_to_vmem [thread:$0]  %s554_s0, 128, %s484_s21, [#allocation3], %s446_s30, %s446_s30, %s447_s6  }
  0x23   :  { %s448_s18 = smov [#allocation7]   ;;  %s394_s23 = scalar_lea.hbm %s557_s3, 1024 }
  0x24   :  { %s44_s19 = sshll.u32 %s448_s18, 4  ;;  %p395_p2 = scmp.ne.s32.totalorder %s557_s3, %s394_s23  ;;  %s45_s19 = int_to_ptr.vmem [resolvable:$true] %s44_s19 }
  0x25   :  { %p398_p3 = scmp.lt.u32.totalorder %s394_s23, %s557_s3 }
  0x27   :  { %p400_p4 = pnand %p398_p3, %p395_p2 }
  0x29   :  { %403 = shalt.err (!%p400_p4)
}
  0x2a   :  { %s404_s28 = scalar_lea.vmem %s45_s19, 1024  ;;  %p409_p6 = scmp.lt.s32.totalorder %s45_s19, %s45_s19 }
  0x2b   :  { %p405_p5 = scmp.ne.s32.totalorder %s45_s19, %s404_s28  ;;  %p410_p7 = scmp.lt.s32.totalorder %s404_s28, %s404_s28 }
  0x2d   :  { %p411_p8 = por %p410_p7, %p409_p6 }
  0x2f   :  { %p412_p9 = pnand %p411_p8, %p405_p5 }
  0x31   :  { %415 = shalt.err (!%p412_p9)
}
  0x32   :  { %50 = dma.hbm_to_vmem [thread:$0]  %s557_s3, 1024, %s45_s19, [#allocation6], %s446_s30, %s446_s30, %s447_s6  }
  0x33   :  { %438 = dma.done.wait [#allocation3], 128  }
  0x34   :  { %439 = vsyncadd [#allocation3], 4294967168 }
  0x35   :  { %440 = dma.done.wait [#allocation6], 1280  }
  0x36   :  { %441 = vsyncadd [#allocation6], 4294966016  ;;  %v449_v0 = vmov 0.0   ;;  %vm450_vm0 = vmmov 0   ;;  %v339_v1 = vld [vmem:[#allocation5] sm:$0xff]   ;;  %v340_v2 = vld [vmem:[#allocation5 + $0x8] sm:$0xff]  }
  0x37   :  { %301 = vmatprep.subr.bf16.mxu0 %v449_v0  ;;  %305 = vmatprep.mubr.msk.bf16.mxu0 %vm450_vm0, %v449_v0  ;;  %v342_v3 = vld [vmem:[#allocation7] sm:$0xff]   ;;  %v341_v4 = vld [vmem:[#allocation2] sm:$0xff]   ;;  %vm93_vm1 = vcmask 261120   ;;  %v344_v6 = vld [vmem:[#allocation7 + $0x10] sm:$0xff]   ;;  %s451_s7 = smov [#allocation8]  }
  0x38   :  { %309 = vmatprep.subr.bf16.mxu1 %v449_v0  ;;  %325 = vmatprep.mubr.msk.bf16.mxu1 %vm450_vm0, %v449_v0  ;;  %v343_v5 = vld [vmem:[#allocation7 + $0x8] sm:$0xff]   ;;  %v345_v7 = vld [vmem:[#allocation7 + $0x18] sm:$0xff]   ;;  %v346_v8 = vld [vmem:[#allocation7 + $0x20] sm:$0xff]   ;;  %s262_s8 = sshll.u32 %s451_s7, 4  ;;  %s263_s8 = int_to_ptr.vmem [resolvable:$true] %s262_s8 }
  0x39   :  { %302 = vmatpush3.bf16.msra.mxu0 %v339_v1  ;;  %310 = vmatpush3.bf16.msra.mxu1 %v342_v3  ;;  %v347_v9 = vld [vmem:[#allocation7 + $0x28] sm:$0xff]   ;;  %v348_v10 = vld [vmem:[#allocation7 + $0x30] sm:$0xff]   ;;  %v349_v11 = vld [vmem:[#allocation7 + $0x38] sm:$0xff]   ;;  %p421_p11 = scmp.lt.s32.totalorder %s263_s8, %s263_s8 }
  0x3a   :  { %303 = vmatprep.subr.bf16.mxu0 %v449_v0  ;;  %311 = vmatprep.subr.bf16.mxu1 %v449_v0  ;;  %v275_v12 = vld [vmem:[%s556_s2] ss:$0 sm:$0xff]  ;;  %s416_s2 = scalar_lea.vmem %s263_s8, 256 }
  0x3b   :  { %v280_v22 = vld [vmem:[%s558_s4] ss:$0 sm:$0xff]  ;;  %p417_p10 = scmp.ne.s32.totalorder %s263_s8, %s416_s2  ;;  %p422_p12 = scmp.lt.s32.totalorder %s416_s2, %s416_s2 }
  0x3d   :  { %304 = vmatpush3.bf16.msra.mxu0 %v340_v2  ;;  %312 = vmatpush3.bf16.msra.mxu1 %v343_v5  ;;  %p423_p13 = por %p422_p12, %p421_p11 }
  0x3e   :  { %313 = vmatprep.subr.bf16.mxu1 %v449_v0 }
  0x3f   :  { %p424_p0 = pnand %p423_p13, %p417_p10 }
  0x40   :  { %306 = vmatmul.mubr.msk.bf16.vlgmr.msra.gmra.mrb[0].mxu0 %vm93_vm1, %v341_v4 }
  0x41   :  { %314 = vmatpush3.bf16.msra.mxu1 %v344_v6 }
  0x42   :  { %315 = vmatprep.subr.bf16.mxu1 %v449_v0 }
  0x45   :  { %316 = vmatpush3.bf16.msra.mxu1 %v345_v7 }
  0x46   :  { %317 = vmatprep.subr.bf16.mxu1 %v449_v0 }
  0x49   :  { %318 = vmatpush3.bf16.msra.mxu1 %v346_v8 }
  0x4a   :  { %319 = vmatprep.subr.bf16.mxu1 %v449_v0 }
  0x4d   :  { %320 = vmatpush3.bf16.msra.mxu1 %v347_v9 }
  0x4e   :  { %321 = vmatprep.subr.bf16.mxu1 %v449_v0 }
  0x51   :  { %322 = vmatpush3.bf16.msra.mxu1 %v348_v10 }
  0x52   :  { %323 = vmatprep.subr.bf16.mxu1 %v449_v0 }
  0x55   :  { %324 = vmatpush3.bf16.msra.mxu1 %v349_v11 }
 0x113   :  { %v131_v13 = vpop.f32.mrb[0].mxu0 }
 0x114   :  { %v132_v14 = vadd.f32 %v275_v12, %v131_v13  ;;  %v307_v15 = vpop.f32.mrb[1].mxu0 }
 0x115   :  { %v134_v16 = vpop.f32.mrb[2].mxu0 }
 0x116   :  { %v135_v17 = vadd.f32 %v275_v12, %v134_v16  ;;  %v308_v18 = vpop.f32.mrb[3].mxu0  ;;  %v138_v19 = vmax.f32 %v132_v14, 0.0 }
 0x118   :  { %v139_v20 = vmax.f32 %v135_v17, 0.0 }
 0x11a   :  { %v140_v21 = vpack.c.bf16 %v139_v20, %v138_v19 }
 0x11c   :  { %326 = vmatmul.mubr.bf16.vlgmr.msra.gmra.mrb[0].mxu1 %v140_v21 }
 0x1ef   :  { %v246_v23 = vpop.f32.mrb[0].mxu1 }
 0x1f0   :  { %v247_v24 = vadd.f32 %v280_v22, %v246_v23  ;;  %v327_v25 = vpop.f32.mrb[1].mxu1 }
 0x1f1   :  { %v249_v26 = vpop.f32.mrb[2].mxu1 }
 0x1f2   :  { %v253_v27 = vmax.f32 %v247_v24, 0.0  ;;  %v250_v28 = vadd.f32 %v280_v22, %v249_v26  ;;  %v328_v29 = vpop.f32.mrb[3].mxu1 }
 0x1f4   :  { %255 = vst [vmem:[#allocation8] sm:$0xff] %v253_v27  ;;  %v254_v30 = vmax.f32 %v250_v28, 0.0 }
 0x1f6   :  { %256 = vst [vmem:[#allocation8 + $0x8] sm:$0xff] %v254_v30 }
 0x1f7   :  { %427 = shalt.err (!%p424_p0)
}
 0x1f8   :  { %s428_s10 = scalar_lea.hbm %s559_s5, 256 }
 0x1f9   :  { %p429_p1 = scmp.ne.s32.totalorder %s559_s5, %s428_s10  ;;  %p432_p2 = scmp.lt.u32.totalorder %s428_s10, %s559_s5 }
 0x1fb   :  { %p434_p3 = pnand %p432_p2, %p429_p1 }
 0x1fd   :  { %437 = shalt.err (!%p434_p3)
}
 0x1fe   :  { %s452_s15 = smov 128   ;;  %s453_s16 = smov 8  }
 0x1ff   :  { %268 = dma.vmem_to_hbm [thread:$0]  %s263_s8, 256, %s559_s5, [#allocation4], %s452_s15, %s452_s15, %s453_s16  }
 0x200   :  { %442 = dma.done.wait [#allocation4], 256  }
 0x201   :  { %443 = vsyncadd [#allocation4], 4294967040 }
 0x202   :  { %272 = vsyncpa [#allocation3], 1 }
 0x203   :  { %273 = vsyncpa [#allocation6], 1 }
 0x204   :  { %274 = vsyncpa [#allocation4], 1 }

</bundles_post_ra>
